<compile_context>
chip_gen: v7x
topology: tpu7x:2x2x1
jax: 0.10.0
libtpu: 0.0.40
codegen_flags: <defaults>
</compile_context>

<pallas_src>
import functools

import jax
import jax.numpy as jnp
from jax import lax
from jax.experimental import pallas as pl
from jax.experimental.pallas import tpu as pltpu


# ----------------------------- Pallas kernel --------------------------------


def _basic_block_kernel(x_ref, w1_ref, w2_ref, b1_ref, b2_ref, o_ref, *,
                        H, W, C1, C2, pad, d):
    """Fused relu(conv1(x)+b1) -> conv2(.)+b2 + x  (BN scales folded into w).

    Layouts (per image, 2-D; channels folded into lanes, and the image's
    top/bottom half-rows folded side by side so HBM blocks are 2*W*C lanes):
      x_ref  : (1, H/2, 2*W*C1) f32   folded input (also the residual)
      w*_ref : (3, 3*W*Cin, W*Cout) bf16   per-kh group of kron(I_W, w_tap)
      b*_ref : (1, W*Cout) f32        per-channel BN bias tiled across W
      o_ref  : (1, H/2, 2*W*C2) f32   folded output
    """
    WC1, WC2 = W * C1, W * C2
    H2 = H // 2

    xf = x_ref[0]                                              # (H/2, 2*W*C1) f32
    # Unfold lanes -> rows: lanes [0, WC1) hold rows [0, H/2),
    # lanes [WC1, 2*WC1) hold rows [H/2, H).
    x2d = jnp.concatenate([xf[:, :WC1], xf[:, WC1:]], axis=0)  # (H, W*C1) f32

    def conv3x3(act_f32, w_ref, cin):
        """3x3 conv (dilation d, zero pad `pad`) on a (H, W*cin) f32 slab."""
        wcin = W * cin
        # Zero-pad in registers (f32 concats: cheapest / safest relayouts).
        zr = jnp.zeros((pad, wcin), jnp.float32)
        ap = jnp.concatenate([zr, act_f32, zr], axis=0)        # (H+2p, W*cin)
        zc = jnp.zeros((H + 2 * pad, pad * cin), jnp.float32)
        ap = jnp.concatenate([zc, ap, zc], axis=1)             # (H+2p, (W+2p)*cin)
        # 3 kw-shifted full-height slabs: 3 lane shifts total, reused over kh.
        xs = [ap[:, kw * d * cin: kw * d * cin + wcin] for kw in range(3)]
        acc = jnp.zeros((H, WC2), jnp.float32)
        for kh in range(3):
            # kh row-group: lane-concat the 3 kw taps -> one K = 3*W*cin matmul.
            patch = jnp.concatenate(
                [xs[kw][kh * d: kh * d + H, :] for kw in range(3)], axis=-1)
            acc = acc + jnp.dot(patch.astype(jnp.bfloat16), w_ref[kh],
                                preferred_element_type=jnp.float32)
        return acc

    # conv1 + BN1 (scale folded) + ReLU -- y1 lives entirely in registers.
    y1 = jnp.maximum(conv3x3(x2d, w1_ref, C1) + b1_ref[...], 0.0)    # (H, W*C2)

    # conv2 + BN2 (scale folded) + bias.
    out2d = conv3x3(y1, w2_ref, C2) + b2_ref[...]                    # (H, W*C2)

    # Refold rows -> lanes, exact f32 residual add on the lane-dense layout,
    # single full-width aligned store.
    out_f = jnp.concatenate([out2d[:H2, :], out2d[H2:, :]], axis=-1)  # (H/2, 2*W*C2)
    o_ref[0] = (out_f + xf).astype(o_ref.dtype)


# ------------------------------- JAX glue ------------------------------------


def fold_bn(gamma, beta, mean, var, eps=1e-5):
    scale = gamma / jnp.sqrt(var + eps)
    bias = beta - mean * scale
    return scale, bias


def _grouped_block_diag_taps(w_hwio, scale, W):
    """(3,3,Cin,Cout) HWIO + per-Cout BN scale -> (3, 3*W*Cin, W*Cout) bf16.

    Tap (kh,kw) becomes kron(I_W, w_tap*scale) so a (H, W*Cin) slab multiplies
    as a plain 2-D matmul; the 3 kw taps of each kh are pre-concatenated along
    K so the kernel issues one K = 3*W*Cin matmul per kh (MXU K-fill)."""
    eye = jnp.eye(W, dtype=jnp.float32)
    groups = []
    for kh in range(3):
        taps = [jnp.kron(eye, w_hwio[kh, kw] * scale[None, :]) for kw in range(3)]
        groups.append(jnp.concatenate(taps, axis=0))           # (3*W*Cin, W*Cout)
    return jnp.stack(groups).astype(jnp.bfloat16)


def prepare_params(params, W):
    """One-time (inference) precompute: BN fold + grouped taps + bias tiling."""
    C2 = params["w1"].shape[-1]
    s1, b1 = fold_bn(*params["bn1"])
    s2, b2 = fold_bn(*params["bn2"])
    return {
        "w1g": _grouped_block_diag_taps(params["w1"], s1, W),
        "w2g": _grouped_block_diag_taps(params["w2"], s2, W),
        "b1t": jnp.tile(b1, W).reshape(1, W * C2).astype(jnp.float32),
        "b2t": jnp.tile(b2, W).reshape(1, W * C2).astype(jnp.float32),
    }


def basic_block_apply_folded(xf, prep, *, H, W, C1, C2, pad, d):
    """Run the fused kernel on the folded (N, H/2, 2*W*C1) f32 layout."""
    N = xf.shape[0]
    kernel = functools.partial(_basic_block_kernel,
                               H=H, W=W, C1=C1, C2=C2, pad=pad, d=d)

    # Report the MACs the MXU actually executes (kron block-diag is W-times
    # redundant); advisory only.
    mxu_flops = 2 * N * 2 * 3 * H * (3 * W * C1) * (W * C2)
    bytes_accessed = (xf.size * 4 + prep["w1g"].size * 2 + prep["w2g"].size * 2
                      + (prep["b1t"].size + prep["b2t"].size) * 4
                      + N * (H // 2) * (2 * W * C2) * 4)

    return pl.pallas_call(
        kernel,
        out_shape=jax.ShapeDtypeStruct((N, H // 2, 2 * W * C2), jnp.float32),
        grid=(N,),
        in_specs=[
            pl.BlockSpec((1, H // 2, 2 * W * C1), lambda i: (i, 0, 0)),  # x (+res)
            pl.BlockSpec((3, 3 * W * C1, W * C2), lambda i: (0, 0, 0)),  # conv1 taps
            pl.BlockSpec((3, 3 * W * C2, W * C2), lambda i: (0, 0, 0)),  # conv2 taps
            pl.BlockSpec((1, W * C2), lambda i: (0, 0)),                 # bn1 bias
            pl.BlockSpec((1, W * C2), lambda i: (0, 0)),                 # bn2 bias
        ],
        out_specs=pl.BlockSpec((1, H // 2, 2 * W * C2), lambda i: (i, 0, 0)),
        compiler_params=pltpu.CompilerParams(
            dimension_semantics=("parallel",)),       # v7x: one image per TC
        cost_estimate=pl.CostEstimate(flops=mxu_flops, transcendentals=0,
                                      bytes_accessed=bytes_accessed),
    )(xf, prep["w1g"], prep["w2g"], prep["b1t"], prep["b2t"])


def basic_block_forward(x_nchw, prep, *, stride=1, p=1, d=1):
    """BasicBlock forward, NCHW in/out (downsample=None => stride 1, c1==c2).

    For stacked blocks, keep activations in the folded layout and call
    basic_block_apply_folded directly to avoid NCHW<->folded HBM round trips.
    """
    assert stride == 1, "downsample=None requires stride 1"
    N, C1, H, W = x_nchw.shape
    C2 = prep["b1t"].shape[-1] // W
    assert C1 == C2, "downsample=None requires c1 == c2"
    pad = d if d > 1 else p
    assert pad == d, "residual add requires output spatial == input spatial"
    assert H % 2 == 0

    x = jnp.transpose(x_nchw, (0, 2, 3, 1)).astype(jnp.float32)   # NCHW -> NHWC
    x2d = x.reshape(N, H, W * C1)
    # Lane-dense fold: top/bottom half-rows side by side in lanes.
    xf = jnp.concatenate([x2d[:, :H // 2, :], x2d[:, H // 2:, :]], axis=-1)

    outf = basic_block_apply_folded(xf, prep, H=H, W=W, C1=C1, C2=C2,
                                    pad=pad, d=d)

    out2d = jnp.concatenate([outf[..., :W * C2], outf[..., W * C2:]], axis=-2)
    out = out2d.reshape(N, H, W, C2)
    return jnp.transpose(out, (0, 3, 1, 2))                        # NHWC -> NCHW


def reference_forward(x_nchw, params, *, stride=1, p=1, d=1, mirror_bf16=True):
    """Pure-JAX reference (lax conv).  With mirror_bf16=True the conv operands
    are rounded to bf16 exactly like the kernel (f32 accumulation)."""
    x = jnp.transpose(x_nchw, (0, 2, 3, 1)).astype(jnp.float32)
    pad = d if d > 1 else p

    def q(a):
        return a.astype(jnp.bfloat16).astype(jnp.float32) if mirror_bf16 else a

    def convbn(h, w, bn, s):
        sc, bi = fold_bn(*bn)
        wf = q(w * sc[None, None, None, :])
        y = lax.conv_general_dilated(
            q(h), wf, window_strides=(s, s),
            padding=[(pad, pad), (pad, pad)], rhs_dilation=(d, d),
            dimension_numbers=("NHWC", "HWIO", "NHWC"),
            preferred_element_type=jnp.float32)
        return y + bi

    y = jax.nn.relu(convbn(x, params["w1"], params["bn1"], stride))
    out = convbn(y, params["w2"], params["bn2"], 1) + x
    return jnp.transpose(out, (0, 3, 1, 2))


# --------------------------------- main ---------------------------------------


if __name__ == "__main__":
    key = jax.random.PRNGKey(0)
    ks = jax.random.split(key, 11)

    C1 = C2 = 4          # c1, c2 (downsample=None => c1 == c2)
    N, H, W = 2, 16, 16
    stride, p, d = 1, 1, 1

    params = {
        "w1": 0.1 * jax.random.normal(ks[0], (3, 3, C1, C2), jnp.float32),
        "w2": 0.1 * jax.random.normal(ks[1], (3, 3, C2, C2), jnp.float32),
        "bn1": (
            1.0 + 0.1 * jax.random.normal(ks[2], (C2,), jnp.float32),     # gamma
            0.1 * jax.random.normal(ks[3], (C2,), jnp.float32),           # beta
            0.1 * jax.random.normal(ks[4], (C2,), jnp.float32),           # mean
            0.5 + jnp.abs(jax.random.normal(ks[5], (C2,), jnp.float32)),  # var
        ),
        "bn2": (
            1.0 + 0.1 * jax.random.normal(ks[6], (C2,), jnp.float32),
            0.1 * jax.random.normal(ks[7], (C2,), jnp.float32),
            0.1 * jax.random.normal(ks[8], (C2,), jnp.float32),
            0.5 + jnp.abs(jax.random.normal(ks[9], (C2,), jnp.float32)),
        ),
    }

    x = jax.random.normal(ks[10], (N, C1, H, W), jnp.float32)

    # One-time weight precompute (hoisted off the per-call critical path).
    prep = prepare_params(params, W)

    out = basic_block_forward(x, prep, stride=stride, p=p, d=d)
    out = jax.block_until_ready(out)
    assert out.shape == (N, C2, H, W), out.shape

    # Tight check against a bf16-operand-matched reference.
    ref_bf16 = reference_forward(x, params, stride=stride, p=p, d=d,
                                 mirror_bf16=True)
    err_tight = float(jnp.max(jnp.abs(out - ref_bf16)))
    assert err_tight < 1e-2, err_tight

    # Sanity check against the full-f32 reference (bf16 quantization noise only).
    ref_f32 = reference_forward(x, params, stride=stride, p=p, d=d,
                                mirror_bf16=False)
    err_loose = float(jnp.max(jnp.abs(out - ref_f32)))
    assert err_loose < 1e-1, err_loose

    print("KERNEL_OK")
</pallas_src>

<mosaic_0001>
module attributes {stable_mosaic.version = 11 : i64} {
  func.func @_basic_block_kernel(%arg0: i32, %arg1: memref<1x8x128xf32, #tpu.memory_space<vmem>>, %arg2: memref<3x192x64xbf16, #tpu.memory_space<vmem>>, %arg3: memref<3x192x64xbf16, #tpu.memory_space<vmem>>, %arg4: memref<1x64xf32, #tpu.memory_space<vmem>>, %arg5: memref<1x64xf32, #tpu.memory_space<vmem>>, %arg6: memref<1x8x128xf32, #tpu.memory_space<vmem>>) attributes {dimension_semantics = [#tpu.dimension_semantics<parallel>], iteration_bounds = array<i64: 2>, scalar_prefetch = 0 : i64, scratch_operands = 0 : i64, tpu.core_type = #tpu.core_type<tc>, window_params = [{transform_indices = @transform_0, window_bounds = array<i64: 1, 8, 128>}, {pipeline_mode = #tpu.pipeline_mode<synchronous>, transform_indices = @transform_1, window_bounds = array<i64: 3, 192, 64>}, {pipeline_mode = #tpu.pipeline_mode<synchronous>, transform_indices = @transform_2, window_bounds = array<i64: 3, 192, 64>}, {pipeline_mode = #tpu.pipeline_mode<synchronous>, transform_indices = @transform_3, window_bounds = array<i64: 1, 64>}, {pipeline_mode = #tpu.pipeline_mode<synchronous>, transform_indices = @transform_4, window_bounds = array<i64: 1, 64>}, {transform_indices = @transform_5, window_bounds = array<i64: 1, 8, 128>}]} {
    %c0 = arith.constant 0 : index
    %c0_0 = arith.constant 0 : index
    %c0_1 = arith.constant 0 : index
    %0 = vector.load %arg1[%c0, %c0_0, %c0_1] : memref<1x8x128xf32, #tpu.memory_space<vmem>>, vector<1x8x128xf32>
    %1 = vector.shape_cast %0 : vector<1x8x128xf32> to vector<8x128xf32>
    %2 = vector.extract_strided_slice %1 {offsets = [0, 0], sizes = [8, 64], strides = [1, 1]} : vector<8x128xf32> to vector<8x64xf32>
    %3 = vector.extract_strided_slice %1 {offsets = [0, 64], sizes = [8, 64], strides = [1, 1]} : vector<8x128xf32> to vector<8x64xf32>
    %4 = tpu.concatenate %2, %3 in 0 : vector<8x64xf32>, vector<8x64xf32> -> vector<16x64xf32>
    %cst = arith.constant 0.000000e+00 : f32
    %5 = vector.broadcast %cst : f32 to vector<1x64xf32>
    %6 = tpu.concatenate %5, %4, %5 in 0 : vector<1x64xf32>, vector<16x64xf32>, vector<1x64xf32> -> vector<18x64xf32>
    %cst_2 = arith.constant 0.000000e+00 : f32
    %7 = vector.broadcast %cst_2 : f32 to vector<18x4xf32>
    %8 = tpu.concatenate %7, %6, %7 in 1 : vector<18x4xf32>, vector<18x64xf32>, vector<18x4xf32> -> vector<18x72xf32>
    %9 = vector.extract_strided_slice %8 {offsets = [0, 0], sizes = [18, 64], strides = [1, 1]} : vector<18x72xf32> to vector<18x64xf32>
    %10 = vector.extract_strided_slice %8 {offsets = [0, 4], sizes = [18, 64], strides = [1, 1]} : vector<18x72xf32> to vector<18x64xf32>
    %11 = vector.extract_strided_slice %8 {offsets = [0, 8], sizes = [18, 64], strides = [1, 1]} : vector<18x72xf32> to vector<18x64xf32>
    %cst_3 = arith.constant 0.000000e+00 : f32
    %12 = vector.broadcast %cst_3 : f32 to vector<16x64xf32>
    %13 = vector.extract_strided_slice %9 {offsets = [0, 0], sizes = [16, 64], strides = [1, 1]} : vector<18x64xf32> to vector<16x64xf32>
    %14 = vector.extract_strided_slice %10 {offsets = [0, 0], sizes = [16, 64], strides = [1, 1]} : vector<18x64xf32> to vector<16x64xf32>
    %15 = vector.extract_strided_slice %11 {offsets = [0, 0], sizes = [16, 64], strides = [1, 1]} : vector<18x64xf32> to vector<16x64xf32>
    %16 = tpu.concatenate %13, %14, %15 in 1 : vector<16x64xf32>, vector<16x64xf32>, vector<16x64xf32> -> vector<16x192xf32>
    %17 = arith.truncf %16 : vector<16x192xf32> to vector<16x192xbf16>
    %c0_4 = arith.constant 0 : index
    %c0_5 = arith.constant 0 : index
    %c0_6 = arith.constant 0 : index
    %18 = vector.load %arg2[%c0_4, %c0_5, %c0_6] : memref<3x192x64xbf16, #tpu.memory_space<vmem>>, vector<1x192x64xbf16>
    %19 = vector.shape_cast %18 : vector<1x192x64xbf16> to vector<192x64xbf16>
    %cst_7 = arith.constant dense<0.000000e+00> : vector<16x64xf32>
    %20 = tpu.matmul %17, %19, %cst_7 {dimension_numbers = #tpu.dot_dimension_numbers<[1], [0], [0], [1], [0, 0, 1, 1], [], []>} : vector<16x192xbf16>, vector<192x64xbf16>, vector<16x64xf32> -> vector<16x64xf32>
    %21 = arith.addf %12, %20 : vector<16x64xf32>
    %22 = vector.extract_strided_slice %9 {offsets = [1, 0], sizes = [16, 64], strides = [1, 1]} : vector<18x64xf32> to vector<16x64xf32>
    %23 = vector.extract_strided_slice %10 {offsets = [1, 0], sizes = [16, 64], strides = [1, 1]} : vector<18x64xf32> to vector<16x64xf32>
    %24 = vector.extract_strided_slice %11 {offsets = [1, 0], sizes = [16, 64], strides = [1, 1]} : vector<18x64xf32> to vector<16x64xf32>
    %25 = tpu.concatenate %22, %23, %24 in 1 : vector<16x64xf32>, vector<16x64xf32>, vector<16x64xf32> -> vector<16x192xf32>
    %26 = arith.truncf %25 : vector<16x192xf32> to vector<16x192xbf16>
    %c1 = arith.constant 1 : index
    %c0_8 = arith.constant 0 : index
    %c0_9 = arith.constant 0 : index
    %27 = vector.load %arg2[%c1, %c0_8, %c0_9] : memref<3x192x64xbf16, #tpu.memory_space<vmem>>, vector<1x192x64xbf16>
    %28 = vector.shape_cast %27 : vector<1x192x64xbf16> to vector<192x64xbf16>
    %cst_10 = arith.constant dense<0.000000e+00> : vector<16x64xf32>
    %29 = tpu.matmul %26, %28, %cst_10 {dimension_numbers = #tpu.dot_dimension_numbers<[1], [0], [0], [1], [0, 0, 1, 1], [], []>} : vector<16x192xbf16>, vector<192x64xbf16>, vector<16x64xf32> -> vector<16x64xf32>
    %30 = arith.addf %21, %29 : vector<16x64xf32>
    %31 = vector.extract_strided_slice %9 {offsets = [2, 0], sizes = [16, 64], strides = [1, 1]} : vector<18x64xf32> to vector<16x64xf32>
    %32 = vector.extract_strided_slice %10 {offsets = [2, 0], sizes = [16, 64], strides = [1, 1]} : vector<18x64xf32> to vector<16x64xf32>
    %33 = vector.extract_strided_slice %11 {offsets = [2, 0], sizes = [16, 64], strides = [1, 1]} : vector<18x64xf32> to vector<16x64xf32>
    %34 = tpu.concatenate %31, %32, %33 in 1 : vector<16x64xf32>, vector<16x64xf32>, vector<16x64xf32> -> vector<16x192xf32>
    %35 = arith.truncf %34 : vector<16x192xf32> to vector<16x192xbf16>
    %c2 = arith.constant 2 : index
    %c0_11 = arith.constant 0 : index
    %c0_12 = arith.constant 0 : index
    %36 = vector.load %arg2[%c2, %c0_11, %c0_12] : memref<3x192x64xbf16, #tpu.memory_space<vmem>>, vector<1x192x64xbf16>
    %37 = vector.shape_cast %36 : vector<1x192x64xbf16> to vector<192x64xbf16>
    %cst_13 = arith.constant dense<0.000000e+00> : vector<16x64xf32>
    %38 = tpu.matmul %35, %37, %cst_13 {dimension_numbers = #tpu.dot_dimension_numbers<[1], [0], [0], [1], [0, 0, 1, 1], [], []>} : vector<16x192xbf16>, vector<192x64xbf16>, vector<16x64xf32> -> vector<16x64xf32>
    %39 = arith.addf %30, %38 : vector<16x64xf32>
    %c0_14 = arith.constant 0 : index
    %c0_15 = arith.constant 0 : index
    %40 = vector.load %arg4[%c0_14, %c0_15] : memref<1x64xf32, #tpu.memory_space<vmem>>, vector<1x64xf32>
    %41 = vector.broadcast %40 : vector<1x64xf32> to vector<16x64xf32>
    %42 = arith.addf %39, %41 : vector<16x64xf32>
    %cst_16 = arith.constant 0.000000e+00 : f32
    %43 = vector.broadcast %cst_16 : f32 to vector<16x64xf32>
    %44 = arith.maximumf %42, %43 : vector<16x64xf32>
    %cst_17 = arith.constant 0.000000e+00 : f32
    %45 = vector.broadcast %cst_17 : f32 to vector<1x64xf32>
    %46 = tpu.concatenate %45, %44, %45 in 0 : vector<1x64xf32>, vector<16x64xf32>, vector<1x64xf32> -> vector<18x64xf32>
    %cst_18 = arith.constant 0.000000e+00 : f32
    %47 = vector.broadcast %cst_18 : f32 to vector<18x4xf32>
    %48 = tpu.concatenate %47, %46, %47 in 1 : vector<18x4xf32>, vector<18x64xf32>, vector<18x4xf32> -> vector<18x72xf32>
    %49 = vector.extract_strided_slice %48 {offsets = [0, 0], sizes = [18, 64], strides = [1, 1]} : vector<18x72xf32> to vector<18x64xf32>
    %50 = vector.extract_strided_slice %48 {offsets = [0, 4], sizes = [18, 64], strides = [1, 1]} : vector<18x72xf32> to vector<18x64xf32>
    %51 = vector.extract_strided_slice %48 {offsets = [0, 8], sizes = [18, 64], strides = [1, 1]} : vector<18x72xf32> to vector<18x64xf32>
    %cst_19 = arith.constant 0.000000e+00 : f32
    %52 = vector.broadcast %cst_19 : f32 to vector<16x64xf32>
    %53 = vector.extract_strided_slice %49 {offsets = [0, 0], sizes = [16, 64], strides = [1, 1]} : vector<18x64xf32> to vector<16x64xf32>
    %54 = vector.extract_strided_slice %50 {offsets = [0, 0], sizes = [16, 64], strides = [1, 1]} : vector<18x64xf32> to vector<16x64xf32>
    %55 = vector.extract_strided_slice %51 {offsets = [0, 0], sizes = [16, 64], strides = [1, 1]} : vector<18x64xf32> to vector<16x64xf32>
    %56 = tpu.concatenate %53, %54, %55 in 1 : vector<16x64xf32>, vector<16x64xf32>, vector<16x64xf32> -> vector<16x192xf32>
    %57 = arith.truncf %56 : vector<16x192xf32> to vector<16x192xbf16>
    %c0_20 = arith.constant 0 : index
    %c0_21 = arith.constant 0 : index
    %c0_22 = arith.constant 0 : index
    %58 = vector.load %arg3[%c0_20, %c0_21, %c0_22] : memref<3x192x64xbf16, #tpu.memory_space<vmem>>, vector<1x192x64xbf16>
    %59 = vector.shape_cast %58 : vector<1x192x64xbf16> to vector<192x64xbf16>
    %cst_23 = arith.constant dense<0.000000e+00> : vector<16x64xf32>
    %60 = tpu.matmul %57, %59, %cst_23 {dimension_numbers = #tpu.dot_dimension_numbers<[1], [0], [0], [1], [0, 0, 1, 1], [], []>} : vector<16x192xbf16>, vector<192x64xbf16>, vector<16x64xf32> -> vector<16x64xf32>
    %61 = arith.addf %52, %60 : vector<16x64xf32>
    %62 = vector.extract_strided_slice %49 {offsets = [1, 0], sizes = [16, 64], strides = [1, 1]} : vector<18x64xf32> to vector<16x64xf32>
    %63 = vector.extract_strided_slice %50 {offsets = [1, 0], sizes = [16, 64], strides = [1, 1]} : vector<18x64xf32> to vector<16x64xf32>
    %64 = vector.extract_strided_slice %51 {offsets = [1, 0], sizes = [16, 64], strides = [1, 1]} : vector<18x64xf32> to vector<16x64xf32>
    %65 = tpu.concatenate %62, %63, %64 in 1 : vector<16x64xf32>, vector<16x64xf32>, vector<16x64xf32> -> vector<16x192xf32>
    %66 = arith.truncf %65 : vector<16x192xf32> to vector<16x192xbf16>
    %c1_24 = arith.constant 1 : index
    %c0_25 = arith.constant 0 : index
    %c0_26 = arith.constant 0 : index
    %67 = vector.load %arg3[%c1_24, %c0_25, %c0_26] : memref<3x192x64xbf16, #tpu.memory_space<vmem>>, vector<1x192x64xbf16>
    %68 = vector.shape_cast %67 : vector<1x192x64xbf16> to vector<192x64xbf16>
    %cst_27 = arith.constant dense<0.000000e+00> : vector<16x64xf32>
    %69 = tpu.matmul %66, %68, %cst_27 {dimension_numbers = #tpu.dot_dimension_numbers<[1], [0], [0], [1], [0, 0, 1, 1], [], []>} : vector<16x192xbf16>, vector<192x64xbf16>, vector<16x64xf32> -> vector<16x64xf32>
    %70 = arith.addf %61, %69 : vector<16x64xf32>
    %71 = vector.extract_strided_slice %49 {offsets = [2, 0], sizes = [16, 64], strides = [1, 1]} : vector<18x64xf32> to vector<16x64xf32>
    %72 = vector.extract_strided_slice %50 {offsets = [2, 0], sizes = [16, 64], strides = [1, 1]} : vector<18x64xf32> to vector<16x64xf32>
    %73 = vector.extract_strided_slice %51 {offsets = [2, 0], sizes = [16, 64], strides = [1, 1]} : vector<18x64xf32> to vector<16x64xf32>
    %74 = tpu.concatenate %71, %72, %73 in 1 : vector<16x64xf32>, vector<16x64xf32>, vector<16x64xf32> -> vector<16x192xf32>
    %75 = arith.truncf %74 : vector<16x192xf32> to vector<16x192xbf16>
    %c2_28 = arith.constant 2 : index
    %c0_29 = arith.constant 0 : index
    %c0_30 = arith.constant 0 : index
    %76 = vector.load %arg3[%c2_28, %c0_29, %c0_30] : memref<3x192x64xbf16, #tpu.memory_space<vmem>>, vector<1x192x64xbf16>
    %77 = vector.shape_cast %76 : vector<1x192x64xbf16> to vector<192x64xbf16>
    %cst_31 = arith.constant dense<0.000000e+00> : vector<16x64xf32>
    %78 = tpu.matmul %75, %77, %cst_31 {dimension_numbers = #tpu.dot_dimension_numbers<[1], [0], [0], [1], [0, 0, 1, 1], [], []>} : vector<16x192xbf16>, vector<192x64xbf16>, vector<16x64xf32> -> vector<16x64xf32>
    %79 = arith.addf %70, %78 : vector<16x64xf32>
    %c0_32 = arith.constant 0 : index
    %c0_33 = arith.constant 0 : index
    %80 = vector.load %arg5[%c0_32, %c0_33] : memref<1x64xf32, #tpu.memory_space<vmem>>, vector<1x64xf32>
    %81 = vector.broadcast %80 : vector<1x64xf32> to vector<16x64xf32>
    %82 = arith.addf %79, %81 : vector<16x64xf32>
    %83 = vector.extract_strided_slice %82 {offsets = [0, 0], sizes = [8, 64], strides = [1, 1]} : vector<16x64xf32> to vector<8x64xf32>
    %84 = vector.extract_strided_slice %82 {offsets = [8, 0], sizes = [8, 64], strides = [1, 1]} : vector<16x64xf32> to vector<8x64xf32>
    %85 = tpu.concatenate %83, %84 in 1 : vector<8x64xf32>, vector<8x64xf32> -> vector<8x128xf32>
    %86 = arith.addf %85, %1 : vector<8x128xf32>
    %c0_34 = arith.constant 0 : index
    %c0_35 = arith.constant 0 : index
    %c0_36 = arith.constant 0 : index
    %87 = vector.load %arg6[%c0_34, %c0_35, %c0_36] : memref<1x8x128xf32, #tpu.memory_space<vmem>>, vector<1x8x128xf32>
    %88 = vector.shape_cast %87 : vector<1x8x128xf32> to vector<8x128xf32>
    %89 = vector.shape_cast %86 : vector<8x128xf32> to vector<1x8x128xf32>
    tpu.vector_store %arg6[%c0_34, %c0_35, %c0_36], %89 {strides = array<i32>} : memref<1x8x128xf32, #tpu.memory_space<vmem>>, vector<1x8x128xf32>,
    return
  }
  func.func @transform_0(%arg0: i32) -> (i32, i32, i32) {
    %c0_i32 = arith.constant 0 : i32
    %c0_i32_0 = arith.constant 0 : i32
    %c0_i32_1 = arith.constant 0 : i32
    return %arg0, %c0_i32, %c0_i32_0 : i32, i32, i32
  }
  func.func @transform_1(%arg0: i32) -> (i32, i32, i32) {
    %c0_i32 = arith.constant 0 : i32
    %c0_i32_0 = arith.constant 0 : i32
    %c0_i32_1 = arith.constant 0 : i32
    %c0_i32_2 = arith.constant 0 : i32
    return %c0_i32, %c0_i32_0, %c0_i32_1 : i32, i32, i32
  }
  func.func @transform_2(%arg0: i32) -> (i32, i32, i32) {
    %c0_i32 = arith.constant 0 : i32
    %c0_i32_0 = arith.constant 0 : i32
    %c0_i32_1 = arith.constant 0 : i32
    %c0_i32_2 = arith.constant 0 : i32
    return %c0_i32, %c0_i32_0, %c0_i32_1 : i32, i32, i32
  }
  func.func @transform_3(%arg0: i32) -> (i32, i32) {
    %c0_i32 = arith.constant 0 : i32
    %c0_i32_0 = arith.constant 0 : i32
    %c0_i32_1 = arith.constant 0 : i32
    return %c0_i32, %c0_i32_0 : i32, i32
  }
  func.func @transform_4(%arg0: i32) -> (i32, i32) {
    %c0_i32 = arith.constant 0 : i32
    %c0_i32_0 = arith.constant 0 : i32
    %c0_i32_1 = arith.constant 0 : i32
    return %c0_i32, %c0_i32_0 : i32, i32
  }
  func.func @transform_5(%arg0: i32) -> (i32, i32, i32) {
    %c0_i32 = arith.constant 0 : i32
    %c0_i32_0 = arith.constant 0 : i32
    %c0_i32_1 = arith.constant 0 : i32
    return %arg0, %c0_i32, %c0_i32_0 : i32, i32, i32
  }
}

</mosaic_0001>

<bundles_post_ra>
// kernel: tpu_custom_call.1
= control target key start
LH: loop header
LB: loop body
LE: loop exit
PB: predicated region body
PF: predicated region fallthrough
CT: control target
= control target key end

     0   :  { %10 = vsyncpa [#allocation3], 0  ;;  %s2255_s0 = inlined_call_operand.vmem [shape: f32[2,8,128], index: 0, kind: input, shape index: {}]   ;;  %s2256_s1 = inlined_call_operand.vmem [shape: bf16[3,192,64], index: 1, kind: input, shape index: {}]   ;;  %s2257_s2 = inlined_call_operand.vmem [shape: bf16[3,192,64], index: 2, kind: input, shape index: {}]   ;;  %s2258_s3 = inlined_call_operand.vmem [shape: f32[1,64], index: 3, kind: input, shape index: {}]   ;;  %s2259_s4 = inlined_call_operand.vmem [shape: f32[1,64], index: 4, kind: input, shape index: {}]   ;;  %s2260_s5 = inlined_call_operand.hbm [shape: f32[2,8,128], index: 5, kind: output, shape index: {}]  }
   0x1   :  { %12 = vsyncpa [#allocation3 + $0x1], 0  ;;  %s1788_s18 = smov 0   ;;  %s1790_s19 = smov 0  }
   0x2   :  { %s1792_s20 = smov 0   ;;  %s1794_s21 = smov 0  }
   0x3 LB: > { %s1809_s22 = sadd.s32 4294967295, %s1750_s21   ;;  %s1355_s23 = sadd.s32 4294967294, %s1750_s21   ;;  %s1750_s21 = sphi %s1794_s21, %s2266_s21   ;;  %s1746_s20 = sphi %s1792_s20, %s2265_s20   ;;  %s1742_s19 = sphi %s1790_s19, %s2264_s19   ;;  %s1738_s18 = sphi %s1788_s18, %s2263_s18  }
   0x4   : > { %s1813_s24 = sadd.s32 1, %s1750_s21   ;;  %s135_s25 = sadd.s32 1, %s1746_s20 }
   0x5   : > { %s132_s26 = ssub.s32 %s1750_s21, %s1813_s24  ;;  %p145_p0 = scmp.ne.s32.totalorder %s1746_s20, %s1742_s19 }
   0x6   : > { %p133_p1 = scmp.eq.s32.totalorder %s132_s26, 0  ;;  %p146_p2 = scmp.eq.s32.totalorder %s1809_s22, 1 }
   0x7   : > { %p151_p3 = scmp.ne.s32.totalorder %s1742_s19, %s1738_s18  ;;  %p152_p4 = scmp.eq.s32.totalorder %s1355_s23, 1 }
   0x8   : > { %s1824_s27 = scalar_select %p133_p1, %s1746_s20, %s135_s25  }
   0x9   : > { %p1826_p5 = por %p146_p2, %p145_p0  ;;  %p1830_p6 = por %p152_p4, %p151_p3 }
   0xa   : > { %p1358_p7 = scmp.ge.s32.totalorder %s1750_s21, 1  ;;  %p189_p8 = scmp.lt.s32.totalorder %s1750_s21, 3 }
   0xc   : > { %p190_p9 = pnand %p1358_p7, %p189_p8 }
   0xd   : > { %p216_p10 = scmp.lt.s32.totalorder (!%p190_p9), %s1809_s22, 1  ;;  %s1752_s10 = smov (!%p190_p9), 64   ;;  %vm225_vm0 = vcmask (!%p190_p9), 1040384   ;;  %v1615_v7 = vld [vmem:[%s2256_s1] sm:$0xff] (!%p190_p9)   ;;  %v1754_v10 = vmov (!%p190_p9), 0   ;;  %v1616_v11 = vld [vmem:[%s2256_s1 + $0x8] sm:$0xff] (!%p190_p9)  }
   0xe   : > { %193 = sbr.rel (%p190_p9) target bundleno = 1313 (0x521), region = 40  ;;  %v1617_v8 = vld [vmem:[%s2256_s1 + $0x60] sm:$0xff] (!%p190_p9)   ;;  %s1753_s15 = smov (!%p190_p9), 4   ;;  %546 = vmatprep.subr.bf16.mxu1 (!%p190_p9), %v1754_v10  ;;  %431 = vmatprep.subr.bf16.mxu0 (!%p190_p9), %v1754_v10  ;;  %v1619_v12 = vld [vmem:[%s2256_s1 + $0x68] sm:$0xff] (!%p190_p9)   ;;  %v1618_v13 = vld [vmem:[%s2256_s1 + $0x10] sm:$0xff] (!%p190_p9)   ;;  %vm244_vm1 = vcmask (!%p190_p9), 31744  }
   0xf   : > { %547 = vmatpush1.bf16.msra.mxu1 (!%p190_p9), %v1615_v7  ;;  %432 = vmatpush1.bf16.msra.mxu0 (!%p190_p9), %v1617_v8  ;;  %v1621_v14 = vld [vmem:[%s2256_s1 + $0x70] sm:$0xff] (!%p190_p9)   ;;  %v1620_v15 = vld [vmem:[%s2256_s1 + $0x18] sm:$0xff] (!%p190_p9)   ;;  %v1622_v17 = vld [vmem:[%s2256_s1 + $0x20] sm:$0xff] (!%p190_p9)   ;;  %vm248_vm2 = vcmask (!%p190_p9), 556032   ;;  %vm266_vm3 = vcmask (!%p190_p9), 523264   ;;  %vm616_vm5 = vcmask (!%p190_p9), 1046528  }
  0x10   : > { %548 = vmatprep.subr.bf16.mxu1 (!%p190_p9), %v1754_v10  ;;  %433 = vmatprep.subr.bf16.mxu0 (!%p190_p9), %v1754_v10  ;;  %v1623_v16 = vld [vmem:[%s2256_s1 + $0x78] sm:$0xff] (!%p190_p9)   ;;  %v1625_v18 = vld [vmem:[%s2256_s1 + $0x80] sm:$0xff] (!%p190_p9)   ;;  %v1624_v19 = vld [vmem:[%s2256_s1 + $0x28] sm:$0xff] (!%p190_p9)   ;;  %vm330_vm4 = vsmask.f32 (!%p190_p9), 7424  ;;  %s213_s12 = sand.u32 (!%p190_p9), 1, %s1742_s19  }
  0x11   : > { %v1627_v20 = vld [vmem:[%s2256_s1 + $0x88] sm:$0xff] (!%p190_p9)   ;;  %v1626_v21 = vld [vmem:[%s2256_s1 + $0x30] sm:$0xff] (!%p190_p9)   ;;  %v1628_v23 = vld [vmem:[%s2256_s1 + $0x38] sm:$0xff] (!%p190_p9)   ;;  %s1359_s13 = sshll.u32 (!%p190_p9), %s213_s12, 3  ;;  %s1757_s23 = smov (!%p190_p9), [#allocation2]  }
  0x12   : > { %v1629_v22 = vld [vmem:[%s2256_s1 + $0x90] sm:$0xff] (!%p190_p9)   ;;  %v1631_v24 = vld [vmem:[%s2256_s1 + $0x98] sm:$0xff] (!%p190_p9)   ;;  %v1630_v25 = vld [vmem:[%s2256_s1 + $0x40] sm:$0xff] (!%p190_p9)  }
  0x13   : > { %549 = vmatpush1.bf16.msra.mxu1 (!%p190_p9), %v1616_v11  ;;  %434 = vmatpush1.bf16.msra.mxu0 (!%p190_p9), %v1619_v12  ;;  %v1633_v26 = vld [vmem:[%s2256_s1 + $0xa0] sm:$0xff] (!%p190_p9)   ;;  %v1632_v27 = vld [vmem:[%s2256_s1 + $0x48] sm:$0xff] (!%p190_p9)   ;;  %v1634_v28 = vld [vmem:[%s2256_s1 + $0x50] sm:$0xff] (!%p190_p9)  }
  0x14   : > { %550 = vmatprep.subr.bf16.mxu1 (!%p190_p9), %v1754_v10  ;;  %435 = vmatprep.subr.bf16.mxu0 (!%p190_p9), %v1754_v10  ;;  %v1635_v29 = vld [vmem:[%s2256_s1 + $0xa8] sm:$0xff] (!%p190_p9)   ;;  %v1636_v30 = vld [vmem:[%s2256_s1 + $0x58] sm:$0xff] (!%p190_p9)   ;;  %v1637_v31 = vld [vmem:[%s2256_s1 + $0xb0] sm:$0xff] (!%p190_p9)  }
  0x15   : > { %s217_s30 = scalar_select %p216_p10, %s1809_s22, 1  ;;  %v1638_v33 = vld [vmem:[%s2256_s1 + $0xb8] sm:$0xff]   ;;  %v1639_v8 = vld [vmem:[%s2256_s1 + $0xc0] sm:$0xff]  }
  0x17   : > { %s1360_s6 = sshll.u32 %s217_s30, 3  ;;  %551 = vmatpush1.bf16.msra.mxu1 %v1618_v13  ;;  %436 = vmatpush1.bf16.msra.mxu0 %v1621_v14  ;;  %s1755_s30 = smov 120   ;;  %v1640_v14 = vld [vmem:[%s2256_s1 + $0xc8] sm:$0xff]  }
  0x18   : > { %s1841_s9 = scalar_lea.vmem %s2255_s0, %s1360_s6  ;;  %552 = vmatprep.subr.bf16.mxu1 %v1754_v10  ;;  %437 = vmatprep.subr.bf16.mxu0 %v1754_v10  ;;  %s1756_s6 = smov 60  }
  0x19   : > { %v221_v0 = vld [vmem:[%s1841_s9] sm:$0xff] }
  0x1a   : > { %223 = vrot.lane.b32.xlu0 %v221_v0, %s1752_s10  ;;  %v226_v1 = vrot.slane %v221_v0, 7 }
  0x1b   : > { %553 = vmatpush1.bf16.msra.mxu1 %v1620_v15  ;;  %438 = vmatpush1.bf16.msra.mxu0 %v1623_v16  ;;  %v1641_v15 = vld [vmem:[%s2256_s1 + $0xd0] sm:$0xff]   ;;  %v1642_v16 = vld [vmem:[%s2256_s1 + $0xd8] sm:$0xff]  }
  0x1c   : > { %v231_v4 = vsel %vm225_vm0, 0.0, %v226_v1  ;;  %554 = vmatprep.subr.bf16.mxu1 %v1754_v10  ;;  %439 = vmatprep.subr.bf16.mxu0 %v1754_v10 }
  0x1f   : > { %555 = vmatpush1.bf16.msra.mxu1 %v1622_v17  ;;  %440 = vmatpush1.bf16.msra.mxu0 %v1625_v18  ;;  %v1643_v17 = vld [vmem:[%s2256_s1 + $0xe0] sm:$0xff]   ;;  %v1644_v18 = vld [vmem:[%s2256_s1 + $0xe8] sm:$0xff]  }
  0x20   : > { %556 = vmatprep.subr.bf16.mxu1 %v1754_v10  ;;  %441 = vmatprep.subr.bf16.mxu0 %v1754_v10 }
  0x23   : > { %557 = vmatpush1.bf16.msra.mxu1 %v1624_v19  ;;  %442 = vmatpush1.bf16.msra.mxu0 %v1627_v20  ;;  %v1645_v19 = vld [vmem:[%s2256_s1 + $0xf0] sm:$0xff]   ;;  %v1646_v20 = vld [vmem:[%s2256_s1 + $0xf8] sm:$0xff]  }
  0x24   : > { %558 = vmatprep.subr.bf16.mxu1 %v1754_v10  ;;  %443 = vmatprep.subr.bf16.mxu0 %v1754_v10 }
  0x27   : > { %559 = vmatpush1.bf16.msra.mxu1 %v1626_v21  ;;  %444 = vmatpush1.bf16.msra.mxu0 %v1629_v22  ;;  %v1647_v21 = vld [vmem:[%s2256_s1 + $0x100] sm:$0xff]   ;;  %v1648_v22 = vld [vmem:[%s2256_s1 + $0x108] sm:$0xff]  }
  0x28   : > { %560 = vmatprep.subr.bf16.mxu1 %v1754_v10  ;;  %445 = vmatprep.subr.bf16.mxu0 %v1754_v10 }
  0x2b   : > { %561 = vmatpush1.bf16.msra.mxu1 %v1628_v23  ;;  %446 = vmatpush1.bf16.msra.mxu0 %v1631_v24  ;;  %v1649_v23 = vld [vmem:[%s2256_s1 + $0x110] sm:$0xff]   ;;  %v1650_v24 = vld [vmem:[%s2256_s1 + $0x118] sm:$0xff]  }
  0x2c   : > { %562 = vmatprep.subr.bf16.mxu1 %v1754_v10  ;;  %447 = vmatprep.subr.bf16.mxu0 %v1754_v10 }
  0x2f   : > { %563 = vmatpush1.bf16.msra.mxu1 %v1630_v25  ;;  %448 = vmatpush1.bf16.msra.mxu0 %v1633_v26 }
  0x30   : > { %564 = vmatprep.subr.bf16.mxu1 %v1754_v10  ;;  %449 = vmatprep.subr.bf16.mxu0 %v1754_v10 }
  0x33   : > { %565 = vmatpush1.bf16.msra.mxu1 %v1632_v27  ;;  %450 = vmatpush1.bf16.msra.mxu0 %v1635_v29 }
  0x34   : > { %566 = vmatprep.subr.bf16.mxu1 %v1754_v10  ;;  %451 = vmatprep.subr.bf16.mxu0 %v1754_v10 }
  0x37   : > { %567 = vmatpush1.bf16.msra.mxu1 %v1634_v28  ;;  %452 = vmatpush1.bf16.msra.mxu0 %v1637_v31 }
  0x38   : > { %568 = vmatprep.subr.bf16.mxu1 %v1754_v10  ;;  %453 = vmatprep.subr.bf16.mxu0 %v1754_v10 }
  0x3b   : > { %569 = vmatpush1.bf16.msra.mxu1 %v1636_v30  ;;  %454 = vmatpush1.bf16.msra.mxu0 %v1638_v33 }
  0x3c   : > { %956 = vmatprep.subr.bf16.mxu1 %v1754_v10  ;;  %699 = vmatprep.subr.bf16.mxu0 %v1754_v10 }
  0x8c   : > { %v224_v2 = vpop.permute.xlu0 %223 }
  0x8d   : > { %v227_v3 = vrot.slane %v224_v2, 7 }
  0x8f   : > { %v232_v5 = vsel %vm225_vm0, %v227_v3, 0.0  ;;  %v228_v6 = vsel %vm225_vm0, %v226_v1, %v227_v3 }
  0x90   : > { %239 = vrot.lane.b32.xlu1 %v232_v5, %s1753_s15  ;;  %v1585_v9 = vpack.i.bf16 %v228_v6, %v231_v4 }
  0x92   : > { %1586 = vrot.lane.b32.xlu0 %v1585_v9, %s1753_s15 }
 0x102   : > { %v240_v38 = vpop.permute.xlu1 %239 }
 0x103   : > { %v247_v42 = vsel %vm244_vm1, 0.0, %v240_v38 }
 0x104   : > { %v1587_v32 = vpop.permute.xlu0 %1586  ;;  %v251_v43 = vsel %vm248_vm2, %v247_v42, 0.0 }
 0x105   : > { %v1589_v34 = vunpack.i.h.bf16 %v1587_v32  ;;  %v1588_v35 = vunpack.i.l.bf16 %v1587_v32 }
 0x107   : > { %v246_v36 = vsel %vm244_vm1, 0.0, %v1589_v34  ;;  %v245_v37 = vsel %vm244_vm1, 0.0, %v1588_v35 }
 0x108   : > { %v250_v39 = vsel %vm248_vm2, %v246_v36, 0.0  ;;  %v249_v40 = vsel %vm248_vm2, %v245_v37, 0.0 }
 0x109   : > { %v1595_v41 = vpack.i.bf16 %v250_v39, %v249_v40 }
 0x10b   : > { %1596 = vrot.lane.b32.xlu0 %v1595_v41, %s1755_s30  ;;  %1591 = vrot.lane.b32.xlu1 %v1595_v41, %s1756_s6 }
 0x10f   : > { %299 = vrot.lane.b32.xlu0 %v251_v43, %s1755_s30  ;;  %296 = vrot.lane.b32.xlu1 %v251_v43, %s1756_s6 }
 0x17d   : > { %v1597_v44 = vpop.permute.xlu0 %1596  ;;  %v1592_v45 = vpop.permute.xlu1 %1591 }
 0x17e   : > { %v1599_v46 = vunpack.i.h.bf16 %v1597_v44  ;;  %v1598_v47 = vunpack.i.l.bf16 %v1597_v44  ;;  %v1594_v48 = vunpack.i.h.bf16 %v1592_v45  ;;  %v1593_v49 = vunpack.i.l.bf16 %v1592_v45 }
 0x180   : > { %v270_v50 = vpack.c.bf16 %v1599_v46, %v1598_v47  ;;  %v268_v51 = vsel %vm266_vm3, %v250_v39, %v1594_v48  ;;  %v267_v52 = vsel %vm266_vm3, %v249_v40, %v1593_v49  ;;  %v1448_v39 = vld [vmem:[%s2258_s3] ss:$0 sm:$0xff] }
 0x181   : > { %v1960_v53 = vpack.c.bf16 %v268_v51, %v267_v52  ;;  %v300_v54 = vpop.permute.xlu0 %299  ;;  %v297_v55 = vpop.permute.xlu1 %296 }
 0x182   : > { %v304_v56 = vpack.c.bf16 %v300_v54, %v300_v54  ;;  %v302_v57 = vsel %vm266_vm3, %v251_v43, %v297_v55  ;;  %1410 = vmatprep.mubr.msk.bf16.mxu1 %vm266_vm3, %v270_v50  ;;  %v346_v58 = vshll.u32 %v270_v50, 16  ;;  %v344_v62 = vshrl.u32 %v270_v50, 16  ;;  %v1651_v54 = vld [vmem:[%s2257_s2] sm:$0xff]  }
 0x183   : > { %v1964_v59 = vpack.c.bf16 %v302_v57, %v302_v57  ;;  %579 = vmatmul.mubr.bf16.vlgmr.msra.gmra.mrb[0].mxu1 %v1960_v53  ;;  %v334_v60 = vshll.u32 %v1960_v53, 16  ;;  %v332_v1 = vshrl.u32 %v1960_v53, 16  ;;  %v620_v11 = vrot.slane %v270_v50, 1  ;;  %v1653_v55 = vld [vmem:[%s2257_s2 + $0x60] sm:$0xff]   ;;  %v1652_v57 = vld [vmem:[%s2257_s2 + $0x8] sm:$0xff]  }
 0x184   : > { %v351_v61 = vshll.u32 %v304_v56, 16  ;;  %v348_v63 = vrot.slane %v346_v58, 1  ;;  %v621_v4 = vrot.slane %v304_v56, 1  ;;  %v617_v26 = vrot.slane %v1960_v53, 1  ;;  %957 = vmatpush1.bf16.msra.mxu1 %v1653_v55  ;;  %v1655_v58 = vld [vmem:[%s2257_s2 + $0x68] sm:$0xff]   ;;  %v1675_v55 = vld [vmem:[%s2257_s2 + $0xc0] sm:$0xff]  }
 0x185   : > { %v339_v0 = vshll.u32 %v1964_v59, 16  ;;  %v336_v2 = vrot.slane %v334_v60, 1  ;;  %v618_v25 = vrot.slane %v1964_v59, 1  ;;  %958 = vmatprep.subr.bf16.mxu1 %v1754_v10  ;;  %v1654_v59 = vld [vmem:[%s2257_s2 + $0x10] sm:$0xff]  }
 0x186   : > { %v353_v3 = vrot.slane %v351_v61, 1  ;;  %v349_v5 = vor.u32 %v348_v63, %v344_v62  ;;  %v622_v13 = vsel %vm616_vm5, %v620_v11, %v621_v4  ;;  %v1657_v60 = vld [vmem:[%s2257_s2 + $0x70] sm:$0xff]   ;;  %v1656_v61 = vld [vmem:[%s2257_s2 + $0x18] sm:$0xff]   ;;  %v1658_v63 = vld [vmem:[%s2257_s2 + $0x20] sm:$0xff]  }
 0x187   : > { %v341_v6 = vrot.slane %v339_v0, 1  ;;  %v337_v7 = vor.u32 %v336_v2, %v332_v1  ;;  %v619_v27 = vsel %vm616_vm5, %v617_v26, %v618_v25  ;;  %v1659_v62 = vld [vmem:[%s2257_s2 + $0x78] sm:$0xff]   ;;  %v1661_v0 = vld [vmem:[%s2257_s2 + $0x80] sm:$0xff]   ;;  %v1660_v1 = vld [vmem:[%s2257_s2 + $0x28] sm:$0xff]  }
 0x188   : > { %v354_v9 = vsel %vm330_vm4, %v349_v5, %v353_v3  ;;  %959 = vmatpush1.bf16.msra.mxu1 %v1655_v58  ;;  %v1663_v2 = vld [vmem:[%s2257_s2 + $0x88] sm:$0xff]   ;;  %v1662_v3 = vld [vmem:[%s2257_s2 + $0x30] sm:$0xff]   ;;  %v1664_v5 = vld [vmem:[%s2257_s2 + $0x38] sm:$0xff]  }
 0x189   : > { %1397 = vmatprep.mubr.msk.bf16.mxu0 %vm266_vm3, %v354_v9  ;;  %v342_v12 = vsel %vm330_vm4, %v337_v7, %v341_v6  ;;  %960 = vmatprep.subr.bf16.mxu1 %v1754_v10  ;;  %v1665_v4 = vld [vmem:[%s2257_s2 + $0x90] sm:$0xff]   ;;  %v1667_v6 = vld [vmem:[%s2257_s2 + $0x98] sm:$0xff]   ;;  %v1666_v7 = vld [vmem:[%s2257_s2 + $0x40] sm:$0xff]  }
 0x18a   : > { %464 = vmatmul.mubr.bf16.vlgmr.msra.gmra.mrb[0].mxu0 %v342_v12  ;;  %v1668_v9 = vld [vmem:[%s2257_s2 + $0x48] sm:$0xff]   ;;  %v1670_v11 = vld [vmem:[%s2257_s2 + $0x50] sm:$0xff]  }
 0x18b   : > { %700 = vmatpush1.bf16.msra.mxu0 %v1639_v8  ;;  %1447 = vmatprep.mubr.msk.bf16.mxu0 %vm266_vm3, %v622_v13  ;;  %v1669_v8 = vld [vmem:[%s2257_s2 + $0xa0] sm:$0xff]   ;;  %v1671_v12 = vld [vmem:[%s2257_s2 + $0xa8] sm:$0xff]   ;;  %v1672_v13 = vld [vmem:[%s2257_s2 + $0x58] sm:$0xff]  }
 0x18c   : > { %701 = vmatprep.subr.bf16.mxu0 %v1754_v10  ;;  %961 = vmatpush1.bf16.msra.mxu1 %v1657_v60  ;;  %v1676_v60 = vld [vmem:[%s2257_s2 + $0xc8] sm:$0xff]  }
 0x18d   : > { %962 = vmatprep.subr.bf16.mxu1 %v1754_v10 }
 0x18f   : > { %702 = vmatpush1.bf16.msra.mxu0 %v1640_v14  ;;  %v1673_v14 = vld [vmem:[%s2257_s2 + $0xb0] sm:$0xff]  }
 0x190   : > { %703 = vmatprep.subr.bf16.mxu0 %v1754_v10  ;;  %963 = vmatpush1.bf16.msra.mxu1 %v1659_v62  ;;  %v1678_v62 = vld [vmem:[%s2257_s2 + $0xd8] sm:$0xff]  }
 0x191   : > { %964 = vmatprep.subr.bf16.mxu1 %v1754_v10 }
 0x193   : > { %704 = vmatpush1.bf16.msra.mxu0 %v1641_v15 }
 0x194   : > { %705 = vmatprep.subr.bf16.mxu0 %v1754_v10  ;;  %965 = vmatpush1.bf16.msra.mxu1 %v1661_v0  ;;  %v1680_v0 = vld [vmem:[%s2257_s2 + $0xe8] sm:$0xff]  }
 0x195   : > { %966 = vmatprep.subr.bf16.mxu1 %v1754_v10 }
 0x197   : > { %706 = vmatpush1.bf16.msra.mxu0 %v1642_v16  ;;  %v1674_v16 = vld [vmem:[%s2257_s2 + $0xb8] sm:$0xff]  }
 0x198   : > { %707 = vmatprep.subr.bf16.mxu0 %v1754_v10  ;;  %967 = vmatpush1.bf16.msra.mxu1 %v1663_v2  ;;  %v1682_v2 = vld [vmem:[%s2257_s2 + $0xf8] sm:$0xff]  }
 0x199   : > { %968 = vmatprep.subr.bf16.mxu1 %v1754_v10 }
 0x19b   : > { %708 = vmatpush1.bf16.msra.mxu0 %v1643_v17 }
 0x19c   : > { %709 = vmatprep.subr.bf16.mxu0 %v1754_v10  ;;  %969 = vmatpush1.bf16.msra.mxu1 %v1665_v4  ;;  %v1684_v4 = vld [vmem:[%s2257_s2 + $0x108] sm:$0xff]  }
 0x19d   : > { %970 = vmatprep.subr.bf16.mxu1 %v1754_v10 }
 0x19f   : > { %710 = vmatpush1.bf16.msra.mxu0 %v1644_v18 }
 0x1a0   : > { %711 = vmatprep.subr.bf16.mxu0 %v1754_v10  ;;  %971 = vmatpush1.bf16.msra.mxu1 %v1667_v6  ;;  %v1686_v6 = vld [vmem:[%s2257_s2 + $0x118] sm:$0xff]  }
 0x1a1   : > { %972 = vmatprep.subr.bf16.mxu1 %v1754_v10 }
 0x1a3   : > { %712 = vmatpush1.bf16.msra.mxu0 %v1645_v19 }
 0x1a4   : > { %713 = vmatprep.subr.bf16.mxu0 %v1754_v10  ;;  %973 = vmatpush1.bf16.msra.mxu1 %v1669_v8 }
 0x1a5   : > { %974 = vmatprep.subr.bf16.mxu1 %v1754_v10 }
 0x1a7   : > { %714 = vmatpush1.bf16.msra.mxu0 %v1646_v20 }
 0x1a8   : > { %715 = vmatprep.subr.bf16.mxu0 %v1754_v10  ;;  %975 = vmatpush1.bf16.msra.mxu1 %v1671_v12 }
 0x1a9   : > { %976 = vmatprep.subr.bf16.mxu1 %v1754_v10 }
 0x1ab   : > { %716 = vmatpush1.bf16.msra.mxu0 %v1647_v21 }
 0x1ac   : > { %717 = vmatprep.subr.bf16.mxu0 %v1754_v10  ;;  %977 = vmatpush1.bf16.msra.mxu1 %v1673_v14 }
 0x1ad   : > { %978 = vmatprep.subr.bf16.mxu1 %v1754_v10 }
 0x1af   : > { %718 = vmatpush1.bf16.msra.mxu0 %v1648_v22 }
 0x1b0   : > { %719 = vmatprep.subr.bf16.mxu0 %v1754_v10  ;;  %979 = vmatpush1.bf16.msra.mxu1 %v1674_v16 }
 0x1b1   : > { %1223 = vmatprep.subr.bf16.mxu1 %v1754_v10 }
 0x1b3   : > { %720 = vmatpush1.bf16.msra.mxu0 %v1649_v23 }
 0x1b4   : > { %721 = vmatprep.subr.bf16.mxu0 %v1754_v10 }
 0x1b7   : > { %722 = vmatpush1.bf16.msra.mxu0 %v1650_v24 }
 0x1b8   : > { %1071 = vmatprep.subr.bf16.mxu0 %v1754_v10 }
 0x1ba   : > { %732 = vmatmul.mubr.bf16.vlgmr.msra.gmra.mrb[4].mxu0 %v619_v27 }
 0x1bb   : > { %1072 = vmatpush1.bf16.msra.mxu0 %v1651_v54 }
 0x1bc   : > { %1073 = vmatprep.subr.bf16.mxu0 %v1754_v10 }
 0x1bf   : > { %1074 = vmatpush1.bf16.msra.mxu0 %v1652_v57 }
 0x1c0   : > { %1075 = vmatprep.subr.bf16.mxu0 %v1754_v10 }
 0x1c3   : > { %1076 = vmatpush1.bf16.msra.mxu0 %v1654_v59 }
 0x1c4   : > { %1077 = vmatprep.subr.bf16.mxu0 %v1754_v10 }
 0x1c7   : > { %1078 = vmatpush1.bf16.msra.mxu0 %v1656_v61  ;;  %v1677_v61 = vld [vmem:[%s2257_s2 + $0xd0] sm:$0xff]  }
 0x1c8   : > { %1079 = vmatprep.subr.bf16.mxu0 %v1754_v10 }
 0x1cb   : > { %1080 = vmatpush1.bf16.msra.mxu0 %v1658_v63  ;;  %v1679_v63 = vld [vmem:[%s2257_s2 + $0xe0] sm:$0xff]  }
 0x1cc   : > { %1081 = vmatprep.subr.bf16.mxu0 %v1754_v10 }
 0x1cf   : > { %1082 = vmatpush1.bf16.msra.mxu0 %v1660_v1  ;;  %v1681_v1 = vld [vmem:[%s2257_s2 + $0xf0] sm:$0xff]  }
 0x1d0   : > { %1083 = vmatprep.subr.bf16.mxu0 %v1754_v10 }
 0x1d3   : > { %1084 = vmatpush1.bf16.msra.mxu0 %v1662_v3  ;;  %v1683_v3 = vld [vmem:[%s2257_s2 + $0x100] sm:$0xff]  }
 0x1d4   : > { %1085 = vmatprep.subr.bf16.mxu0 %v1754_v10 }
 0x1d7   : > { %1086 = vmatpush1.bf16.msra.mxu0 %v1664_v5  ;;  %v1685_v5 = vld [vmem:[%s2257_s2 + $0x110] sm:$0xff]  }
 0x1d8   : > { %1087 = vmatprep.subr.bf16.mxu0 %v1754_v10 }
 0x1db   : > { %1088 = vmatpush1.bf16.msra.mxu0 %v1666_v7 }
 0x1dc   : > { %1089 = vmatprep.subr.bf16.mxu0 %v1754_v10 }
 0x1df   : > { %1090 = vmatpush1.bf16.msra.mxu0 %v1668_v9 }
 0x1e0   : > { %1091 = vmatprep.subr.bf16.mxu0 %v1754_v10 }
 0x1e3   : > { %1092 = vmatpush1.bf16.msra.mxu0 %v1670_v11 }
 0x1e4   : > { %1093 = vmatprep.subr.bf16.mxu0 %v1754_v10 }
 0x1e7   : > { %1094 = vmatpush1.bf16.msra.mxu0 %v1672_v13 }
 0x256   : > { %v580_v28 = vpop.f32.mrb[0].mxu1 }
 0x257   : > { %v582_v29 = vpop.f32.mrb[1].mxu1 }
 0x258   : > { %v583_v30 = vpop.f32.mrb[2].mxu1 }
 0x259   : > { %v585_v31 = vpop.f32.mrb[3].mxu1 }
 0x25d   : > { %v465_v32 = vpop.f32.mrb[0].mxu0 }
 0x25e   : > { %v581_v33 = vadd.f32 %v580_v28, %v465_v32  ;;  %v467_v34 = vpop.f32.mrb[1].mxu0 }
 0x25f   : > { %v468_v35 = vpop.f32.mrb[2].mxu0 }
 0x260   : > { %v584_v36 = vadd.f32 %v583_v30, %v468_v35  ;;  %v470_v37 = vpop.f32.mrb[3].mxu0 }
 0x28d   : > { %v733_v38 = vpop.f32.mrb[4].mxu0 }
 0x28e   : > { %v740_v40 = vadd.f32 %v733_v38, %v581_v33  ;;  %v735_v41 = vpop.f32.mrb[5].mxu0 }
 0x28f   : > { %v736_v42 = vpop.f32.mrb[6].mxu0 }
 0x290   : > { %v749_v43 = vadd.f32 %v1448_v39, %v740_v40  ;;  %v741_v44 = vadd.f32 %v736_v42, %v584_v36  ;;  %v738_v45 = vpop.f32.mrb[7].mxu0 }
 0x292   : > { %v751_v46 = vmax.f32 %v749_v43, 0.0  ;;  %v750_v47 = vadd.f32 %v1448_v39, %v741_v44 }
 0x294   : > { %v755_v48 = vrot.slane %v751_v46, 7  ;;  %v752_v49 = vmax.f32 %v750_v47, 0.0 }
 0x296   : > { %v756_v50 = vrot.slane %v752_v49, 7  ;;  %v760_v53 = vsel %vm225_vm0, 0.0, %v755_v48 }
 0x298   : > { %v761_v51 = vsel %vm225_vm0, %v756_v50, 0.0  ;;  %v757_v52 = vsel %vm225_vm0, %v755_v48, %v756_v50 }
 0x299   : > { %768 = vrot.lane.b32.xlu0 %v761_v51, %s1753_s15  ;;  %v1600_v56 = vpack.i.bf16 %v757_v52, %v760_v53 }
 0x29b   : > { %1601 = vrot.lane.b32.xlu1 %v1600_v56, %s1753_s15 }
 0x30b   : > { %v769_v21 = vpop.permute.xlu0 %768 }
 0x30c   : > { %v775_v25 = vsel %vm244_vm1, 0.0, %v769_v21  ;;  %v1536_v21 = vld [vmem:[%s2259_s4] ss:$0 sm:$0xff] }
 0x30d   : > { %v1602_v15 = vpop.permute.xlu1 %1601  ;;  %v778_v26 = vsel %vm248_vm2, %v775_v25, 0.0 }
 0x30e   : > { %v1604_v17 = vunpack.i.h.bf16 %v1602_v15  ;;  %v1603_v18 = vunpack.i.l.bf16 %v1602_v15 }
 0x310   : > { %v774_v19 = vsel %vm244_vm1, 0.0, %v1604_v17  ;;  %v773_v20 = vsel %vm244_vm1, 0.0, %v1603_v18 }
 0x311   : > { %v777_v22 = vsel %vm248_vm2, %v774_v19, 0.0  ;;  %v776_v23 = vsel %vm248_vm2, %v773_v20, 0.0 }
 0x312   : > { %v1610_v24 = vpack.i.bf16 %v777_v22, %v776_v23 }
 0x314   : > { %1611 = vrot.lane.b32.xlu0 %v1610_v24, %s1755_s30  ;;  %1606 = vrot.lane.b32.xlu1 %v1610_v24, %s1756_s6 }
 0x318   : > { %825 = vrot.lane.b32.xlu0 %v778_v26, %s1755_s30  ;;  %822 = vrot.lane.b32.xlu1 %v778_v26, %s1756_s6  ;;  %s1538_s30 = sshll.u32 %s1809_s22, 7  ;;  %s215_s6 = scalar_lea.vmem [#allocation2], %s1359_s13 }
 0x319   : > { %s1296_s15 = sshll.u32 %s215_s6, 4  ;;  %s2213_s17 = scalar_lea.hbm %s2260_s5, %s1538_s30  ;;  %s2215_s15 = int_to_ptr.vmem [resolvable:$true] %s1296_s15 }
 0x31a   : > { %s1688_s22 = scalar_lea.vmem %s2215_s15, 128 }
 0x31b   : > { %p1689_p11 = scmp.ne.s32.totalorder %s2215_s15, %s1688_s22 }
 0x31d   : > { %p1690_p12 = pnand %p1689_p11, %p1826_p5 }
 0x31f   : > { %p1691_p13 = pneg %p1690_p12 }
 0x386   : > { %v1612_v27 = vpop.permute.xlu0 %1611  ;;  %v1607_v28 = vpop.permute.xlu1 %1606 }
 0x387   : > { %v1614_v29 = vunpack.i.h.bf16 %v1612_v27  ;;  %v1613_v30 = vunpack.i.l.bf16 %v1612_v27  ;;  %v1609_v31 = vunpack.i.h.bf16 %v1607_v28  ;;  %v1608_v32 = vunpack.i.l.bf16 %v1607_v28 }
 0x389   : > { %v796_v33 = vpack.c.bf16 %v1614_v29, %v1613_v30  ;;  %v794_v34 = vsel %vm266_vm3, %v777_v22, %v1609_v31  ;;  %v793_v35 = vsel %vm266_vm3, %v776_v23, %v1608_v32  ;;  %v1687_v31 = vld [vmem:[%s1841_s9] sm:$0xff]  ;;  %s1692_s9 = sshll.u32 %s1757_s23, 4  ;;  %s1693_s9 = int_to_ptr.vmem [resolvable:$false] %s1692_s9 }
 0x38a   : > { %v2141_v36 = vpack.c.bf16 %v794_v34, %v793_v35  ;;  %v826_v37 = vpop.permute.xlu0 %825  ;;  %v823_v38 = vpop.permute.xlu1 %822  ;;  %s1694_s25 = scalar_lea.vmem %s1693_s9, 256  ;;  %p1695_p0 = scmp.lt.s32.totalorder %s2215_s15, %s1693_s9 }
 0x38b   : > { %v830_v39 = vpack.c.bf16 %v826_v37, %v826_v37  ;;  %v828_v40 = vsel %vm266_vm3, %v778_v26, %v823_v38  ;;  %1498 = vmatprep.mubr.msk.bf16.mxu0 %vm266_vm3, %v796_v33  ;;  %v871_v41 = vshll.u32 %v796_v33, 16  ;;  %v869_v45 = vshrl.u32 %v796_v33, 16  ;;  %p1696_p1 = scmp.lt.s32.totalorder %s1694_s25, %s1688_s22 }
 0x38c   : > { %v829_v42 = vpack.c.bf16 %v828_v40, %v828_v40  ;;  %1104 = vmatmul.mubr.bf16.vlgmr.msra.gmra.mrb[8].mxu0 %v2141_v36  ;;  %v859_v43 = vshll.u32 %v2141_v36, 16  ;;  %v857_v48 = vshrl.u32 %v2141_v36, 16  ;;  %v1144_v57 = vrot.slane %v796_v33, 1 }
 0x38d   : > { %v876_v44 = vshll.u32 %v830_v39, 16  ;;  %v873_v46 = vrot.slane %v871_v41, 1  ;;  %v1145_v51 = vrot.slane %v830_v39, 1  ;;  %v1141_v8 = vrot.slane %v2141_v36, 1  ;;  %p1697_p2 = por %p1696_p1, %p1695_p0 }
 0x38e   : > { %v864_v47 = vshll.u32 %v829_v42, 16  ;;  %v861_v49 = vrot.slane %v859_v43, 1  ;;  %v1142_v7 = vrot.slane %v829_v42, 1 }
 0x38f   : > { %v878_v50 = vrot.slane %v876_v44, 1  ;;  %v874_v52 = vor.u32 %v873_v46, %v869_v45  ;;  %v1146_v59 = vsel %vm616_vm5, %v1144_v57, %v1145_v51  ;;  %p1698_p3 = pnand %p1697_p2, %p1691_p13 }
 0x390   : > { %v866_v53 = vrot.slane %v864_v47, 1  ;;  %v862_v54 = vor.u32 %v861_v49, %v857_v48  ;;  %v1143_v9 = vsel %vm616_vm5, %v1141_v8, %v1142_v7 }
 0x391   : > { %v879_v56 = vsel %vm330_vm4, %v874_v52, %v878_v50 }
 0x392   : > { %1485 = vmatprep.mubr.msk.bf16.mxu1 %vm266_vm3, %v879_v56  ;;  %v867_v58 = vsel %vm330_vm4, %v862_v54, %v866_v53 }
 0x393   : > { %989 = vmatmul.mubr.bf16.vlgmr.msra.gmra.mrb[4].mxu1 %v867_v58 }
 0x394   : > { %1224 = vmatpush1.bf16.msra.mxu1 %v1675_v55  ;;  %1535 = vmatprep.mubr.msk.bf16.mxu1 %vm266_vm3, %v1146_v59 }
 0x395   : > { %1225 = vmatprep.subr.bf16.mxu1 %v1754_v10 }
 0x398   : > { %1226 = vmatpush1.bf16.msra.mxu1 %v1676_v60 }
 0x399   : > { %1227 = vmatprep.subr.bf16.mxu1 %v1754_v10 }
 0x39c   : > { %1228 = vmatpush1.bf16.msra.mxu1 %v1677_v61 }
 0x39d   : > { %1229 = vmatprep.subr.bf16.mxu1 %v1754_v10 }
 0x3a0   : > { %1230 = vmatpush1.bf16.msra.mxu1 %v1678_v62 }
 0x3a1   : > { %1231 = vmatprep.subr.bf16.mxu1 %v1754_v10 }
 0x3a4   : > { %1232 = vmatpush1.bf16.msra.mxu1 %v1679_v63 }
 0x3a5   : > { %1233 = vmatprep.subr.bf16.mxu1 %v1754_v10 }
 0x3a8   : > { %1234 = vmatpush1.bf16.msra.mxu1 %v1680_v0 }
 0x3a9   : > { %1235 = vmatprep.subr.bf16.mxu1 %v1754_v10 }
 0x3ac   : > { %1236 = vmatpush1.bf16.msra.mxu1 %v1681_v1 }
 0x3ad   : > { %1237 = vmatprep.subr.bf16.mxu1 %v1754_v10 }
 0x3b0   : > { %1238 = vmatpush1.bf16.msra.mxu1 %v1682_v2 }
 0x3b1   : > { %1239 = vmatprep.subr.bf16.mxu1 %v1754_v10 }
 0x3b4   : > { %1240 = vmatpush1.bf16.msra.mxu1 %v1683_v3 }
 0x3b5   : > { %1241 = vmatprep.subr.bf16.mxu1 %v1754_v10 }
 0x3b8   : > { %1242 = vmatpush1.bf16.msra.mxu1 %v1684_v4 }
 0x3b9   : > { %1243 = vmatprep.subr.bf16.mxu1 %v1754_v10 }
 0x3bc   : > { %1244 = vmatpush1.bf16.msra.mxu1 %v1685_v5 }
 0x3bd   : > { %1245 = vmatprep.subr.bf16.mxu1 %v1754_v10 }
 0x3c0   : > { %1246 = vmatpush1.bf16.msra.mxu1 %v1686_v6 }
 0x3c3   : > { %1256 = vmatmul.mubr.bf16.vlgmr.msra.gmra.mrb[8].mxu1 %v1143_v9 }
 0x45f   : > { %v1105_v11 = vpop.f32.mrb[8].mxu0 }
 0x460   : > { %v1107_v12 = vpop.f32.mrb[9].mxu0 }
 0x461   : > { %v1108_v13 = vpop.f32.mrb[10].mxu0 }
 0x462   : > { %v1110_v14 = vpop.f32.mrb[11].mxu0 }
 0x466   : > { %v990_v15 = vpop.f32.mrb[4].mxu1 }
 0x467   : > { %v1106_v16 = vadd.f32 %v1105_v11, %v990_v15  ;;  %v992_v17 = vpop.f32.mrb[5].mxu1 }
 0x468   : > { %v993_v18 = vpop.f32.mrb[6].mxu1 }
 0x469   : > { %v1109_v19 = vadd.f32 %v1108_v13, %v993_v18  ;;  %v995_v20 = vpop.f32.mrb[7].mxu1 }
 0x496   : > { %v1257_v10 = vpop.f32.mrb[8].mxu1 }
 0x497   : > { %v1264_v22 = vadd.f32 %v1257_v10, %v1106_v16  ;;  %v1259_v23 = vpop.f32.mrb[9].mxu1 }
 0x498   : > { %v1260_v24 = vpop.f32.mrb[10].mxu1 }
 0x499   : > { %v1273_v25 = vadd.f32 %v1536_v21, %v1264_v22  ;;  %v1265_v26 = vadd.f32 %v1260_v24, %v1109_v19  ;;  %v1262_v27 = vpop.f32.mrb[11].mxu1 }
 0x49b   : > { %v1274_v28 = vadd.f32 %v1536_v21, %v1265_v26 }
 0x49d   : > { %1276 = vrot.lane.b32.xlu1 %v1274_v28, %s1752_s10  ;;  %s1283_s10 = scalar_lea.sflag [#allocation3], %s213_s12 }
 0x50f   : > { %v1277_v29 = vpop.permute.xlu1 %1276 }
 0x510   : > { %v1279_v30 = vsel %vm266_vm3, %v1273_v25, %v1277_v29 }
 0x511   : > { %v1280_v32 = vadd.f32 %v1687_v31, %v1279_v30 }
 0x513   : > { %1281 = vst [vmem:[%s215_s6] sm:$0xff] %v1280_v32 }
 0x514   : > { %1701 = shalt.err (!%p1698_p3)
}
 0x515   : > { %s1702_s26 = scalar_lea.hbm %s2213_s17, 128  ;;  %s1706_s11 = scalar_lea.hbm %s2260_s5, 256 }
 0x516   : > { %p1703_p4 = scmp.ne.s32.totalorder %s2213_s17, %s1702_s26  ;;  %p1707_p9 = scmp.lt.u32.totalorder %s2213_s17, %s2260_s5 }
 0x517   : > { %p1708_p10 = scmp.lt.u32.totalorder %s1706_s11, %s1702_s26  ;;  %p1710_p12 = scmp.lt.u32.totalorder %s1702_s26, %s2213_s17 }
 0x518   : > { %p1704_p7 = pnand %p1703_p4, %p1826_p5 }
 0x519   : > { %p1709_p11 = por %p1708_p10, %p1707_p9 }
 0x51a   : > { %p1705_p8 = pneg %p1704_p7 }
 0x51b   : > { %p1711_p13 = por %p1710_p12, %p1709_p11 }
 0x51d   : > { %p1712_p0 = pnand %p1711_p13, %p1705_p8 }
 0x51f   : > { %1715 = shalt.err (!%p1712_p0)
}
 0x520   : > { %1541 = dma.vmem_to_hbm [thread:$0]  (%p1826_p5), %s2215_s15, 128, %s2213_s17, %s1283_s10  }
 0x521 PF: > { %p1547_p1 = scmp.ge.s32.totalorder %s1750_s21, 2  ;;  %s1308_s30 = sand.u32 1, %s1738_s18  }
 0x522   : > { %s1309_s6 = scalar_lea.sflag [#allocation3], %s1308_s30 }
 0x523   : > { %p1544_p2 = pnand %p1547_p1, %p1830_p6 }
 0x525   : > { %1733 = dma.done.wait (!%p1544_p2), %s1309_s6, 128  }
 0x526   : > { %1735 = vsyncadd (!%p1544_p2), %s1309_s6, 4294967168  ;;  %p15_p3 = scmp.ge.s32.totalorder %s1813_s24, 4   ;;  %s2263_s18 = smov %s1742_s19 }
 0x527   : > { %s2264_s19 = smov %s1746_s20  ;;  %s2265_s20 = smov %s1824_s27 }
 0x528   : > { %s2266_s21 = smov %s1813_s24  ;;  %17 = sbr.rel (!%p15_p3) target bundleno = 3 (0x3), region = 79 }
 0x52f   :  { %1314 = vsyncpa [#allocation3], 1 }
 0x530   :  { %1316 = vsyncpa [#allocation3 + $0x1], 1 }

</bundles_post_ra>
